<compile_context>
chip_gen: v7x
topology: tpu7x:2x2x1
jax: 0.10.0
libtpu: 0.0.40
codegen_flags: <defaults>
</compile_context>

<pallas_src>
import functools

import jax
import jax.numpy as jnp
from jax import lax
from jax.experimental import pallas as pl
from jax.experimental.pallas import tpu as pltpu

EPS = 1e-5
_MIB = 1024 * 1024


def _vmem_capacity_bytes():
    """Physical VMEM per core (trace-time query, conservative fallback)."""
    try:
        info = pltpu.get_tpu_info()
        cap = getattr(info, "vmem_capacity_bytes", None)
        if cap:
            return int(cap)
    except Exception:
        pass
    return 64 * _MIB  # v7x-sized fallback: safe everywhere


def _largest_multiple_divisor(total, unit, limit):
    """Largest multiple of `unit` that divides `total` and is <= limit (>= unit)."""
    best = unit
    k = unit
    cap = min(total, max(unit, limit))
    while k <= cap:
        if total % k == 0:
            best = k
        k += unit
    return best


def _largest_divisor(total, limit):
    """Largest divisor of `total` that is <= limit (>= 1)."""
    best = 1
    for d in range(1, min(total, max(1, limit)) + 1):
        if total % d == 0:
            best = d
    return best


def _choose_fused_tc(n, c, hw, itemsize, unit, budget):
    """Channel tile for the fused single-pass kernel, or None if it won't fit.

    VMEM estimate: double-buffered input + output slabs (4x), f32 scratch for
    sum/var accumulators plus in-kernel per-batch-slice temporaries (~6x f32
    rows per channel group).
    """
    if c % unit == 0:
        cands = [t for t in range(unit, c + 1, unit) if c % t == 0]
    else:
        cands = [c]  # block == full dim is always legal

    def fits(t):
        need = 4 * n * t * hw * itemsize + 6 * t * hw * 4
        return need <= budget

    fitting = [t for t in cands if fits(t)]
    if not fitting:
        return None
    # Prefer >= 2 channel groups so a 2-TensorCore part (v7x) can split the grid.
    multi = [t for t in fitting if c // t >= 2]
    return max(multi) if multi else max(fitting)


def _choose_tiles(n, c, hw, itemsize, unit, block_budget):
    """(tn, tc, tm) tiles for the two-pass fallback."""
    # Lane tile: multiple of 128 dividing HW (else the full HW -- block == dim
    # is always legal).
    if hw % 128 == 0:
        tm = _largest_multiple_divisor(hw, 128,
                                       max(128, block_budget // (8 * itemsize)))
    else:
        tm = hw
    # Channel tile: multiple of `unit` dividing C (else full C). Keep >= 2
    # channel groups so the stats pass has a parallel axis.
    if c % unit == 0:
        ch_limit = max(unit, block_budget // (tm * itemsize))
        if c >= 2 * unit:
            ch_limit = min(ch_limit, c // 2)
        tc = _largest_multiple_divisor(c, unit, ch_limit)
    else:
        tc = c
    # Batch tile: fill the remaining per-block byte budget.
    tn = _largest_divisor(n, max(1, block_budget // (tc * tm * itemsize)))
    return tn, tc, tm


# ---------------------------------------------------------------------------
# Fused single-pass kernel: whole (N, tc, HW) channel-group slab resident.
# ---------------------------------------------------------------------------
def _fused_kernel(x_ref, gamma_ref, beta_ref, o_ref, sum_sc, var_sc,
                  *, inv_count, n_batch, unroll):
    sum_sc[...] = jnp.zeros_like(sum_sc)

    @pl.loop(0, n_batch, unroll=unroll)
    def _(i):
        sum_sc[...] += x_ref[i].astype(jnp.float32)          # (tc, hw)

    mean = jnp.sum(sum_sc[...], axis=-1, keepdims=True) * inv_count   # (tc, 1)

    # Centered variance: x is resident in VMEM, so the extra sweep is cheap
    # and avoids E[x^2] - mean^2 cancellation.
    var_sc[...] = jnp.zeros_like(var_sc)

    @pl.loop(0, n_batch, unroll=unroll)
    def _(i):
        d = x_ref[i].astype(jnp.float32) - mean
        var_sc[...] += d * d

    var = jnp.sum(var_sc[...], axis=-1, keepdims=True) * inv_count    # (tc, 1)
    scale = gamma_ref[...] * lax.rsqrt(var + EPS)                     # (tc, 1)
    shift = beta_ref[...] - mean * scale

    @pl.loop(0, n_batch, unroll=unroll)
    def _(i):
        xi = x_ref[i].astype(jnp.float32)
        o_ref[i] = (xi * scale + shift).astype(o_ref.dtype)


# ---------------------------------------------------------------------------
# Two-pass fallback kernels.
# ---------------------------------------------------------------------------
def _stats_kernel(x_ref, gamma_ref, beta_ref, scale_ref, shift_ref,
                  sum_acc, sq_acc, *, inv_count):
    """Accumulate full-width (tc, tm) partial sums; cross-lane reduce deferred
    to the finalize step; fold gamma/beta into per-channel scale/shift."""
    n_id = pl.program_id(1)
    m_id = pl.program_id(2)

    @pl.when(jnp.logical_and(n_id == 0, m_id == 0))
    def _():
        sum_acc[...] = jnp.zeros_like(sum_acc)
        sq_acc[...] = jnp.zeros_like(sq_acc)

    x = x_ref[...].astype(jnp.float32)             # (tn, tc, tm)
    sum_acc[...] += jnp.sum(x, axis=0)             # elementwise adds, no XLU
    sq_acc[...] += jnp.sum(x * x, axis=0)

    @pl.when(jnp.logical_and(n_id == pl.num_programs(1) - 1,
                             m_id == pl.num_programs(2) - 1))
    def _():
        total = jnp.sum(sum_acc[...], axis=-1, keepdims=True)      # one XLU reduce
        total_sq = jnp.sum(sq_acc[...], axis=-1, keepdims=True)
        mean = total * inv_count
        # E[x^2] - mean^2 (clamped); acceptable for typical BN activations.
        var = jnp.maximum(total_sq * inv_count - mean * mean, 0.0)
        scale = gamma_ref[...] * lax.rsqrt(var + EPS)
        scale_ref[...] = scale
        shift_ref[...] = beta_ref[...] - mean * scale


def _normalize_kernel(x_ref, scale_ref, shift_ref, o_ref):
    """y = x * scale + shift, per channel (scale/shift broadcast over N, H*W)."""
    x = x_ref[...].astype(jnp.float32)             # (tn, tc, tm)
    o_ref[...] = (x * scale_ref[...] + shift_ref[...]).astype(o_ref.dtype)


# ---------------------------------------------------------------------------
# Wrapper.
# ---------------------------------------------------------------------------
def dual_batch_norm_2d(x_nchw, gamma, beta, *, force_two_pass=False):
    """Forward of DualBatchNorm2d (route='M', training-mode batch statistics).

    x_nchw: (N, C, H, W)  float32 or bfloat16
    gamma:  (C,)          bn[0].weight
    beta:   (C,)          bn[0].bias
    returns (N, C, H, W) in x_nchw.dtype
    """
    n, c, h, w = x_nchw.shape
    hw = h * w
    x3 = x_nchw.reshape(n, c, hw)                  # free, contiguous view
    itemsize = jnp.dtype(x3.dtype).itemsize
    gamma2 = gamma.reshape(c, 1).astype(jnp.float32)
    beta2 = beta.reshape(c, 1).astype(jnp.float32)
    inv_count = 1.0 / float(n * hw)

    # Per-generation budgets (128 MiB VMEM on v5e/v6e, 64 MiB on v7x).
    cap = _vmem_capacity_bytes()
    vmem_limit = max(32 * _MIB, min(cap - 16 * _MIB, 96 * _MIB))
    block_budget = 4 * _MIB if vmem_limit >= 64 * _MIB else 2 * _MIB
    # bf16 packs 16 rows per sublane tile; match its native (16, 128) layout.
    unit = 16 if (itemsize < 4 and c % 16 == 0) else 8

    # ---------------- fused single-pass path ----------------
    tc_f = None if force_two_pass else _choose_fused_tc(
        n, c, hw, itemsize, unit, vmem_limit - 4 * _MIB)

    if tc_f is not None:
        x_spec = pl.BlockSpec((n, tc_f, hw), lambda cg: (0, cg, 0))
        ch_spec = pl.BlockSpec((tc_f, 1), lambda cg: (cg, 0))
        out3 = pl.pallas_call(
            functools.partial(_fused_kernel, inv_count=inv_count,
                              n_batch=n, unroll=(n <= 8)),
            out_shape=jax.ShapeDtypeStruct((n, c, hw), x3.dtype),
            grid=(c // tc_f,),
            in_specs=[x_spec, ch_spec, ch_spec],
            out_specs=x_spec,
            scratch_shapes=[pltpu.VMEM((tc_f, hw), jnp.float32),
                            pltpu.VMEM((tc_f, hw), jnp.float32)],
            compiler_params=pltpu.CompilerParams(
                dimension_semantics=("parallel",),
                vmem_limit_bytes=vmem_limit),
        )(x3, gamma2, beta2)
        return out3.reshape(n, c, h, w)

    # ---------------- two-pass fallback ----------------
    tn, tc, tm = _choose_tiles(n, c, hw, itemsize, unit, block_budget)
    grid = (c // tc, n // tn, hw // tm)

    # Guard: non-tile-aligned dims can force full-dim blocks; bump the scoped
    # VMEM limit (capped below physical) so the compile still succeeds.
    block_bytes = tn * tc * tm * itemsize
    block_f32 = tn * tc * tm * 4
    scratch_bytes = 2 * tc * tm * 4
    needed = 4 * block_bytes + 3 * block_f32 + scratch_bytes + 4 * _MIB
    vmem_limit = min(max(vmem_limit, needed), max(32 * _MIB, cap - 8 * _MIB))

    x_spec = pl.BlockSpec((tn, tc, tm), lambda cg, ni, mi: (ni, cg, mi))
    ch_spec = pl.BlockSpec((tc, 1), lambda cg, ni, mi: (cg, 0))

    # Pass 1: per-channel statistics -> (scale, shift), each (C, 1) f32.
    scale, shift = pl.pallas_call(
        functools.partial(_stats_kernel, inv_count=inv_count),
        out_shape=(jax.ShapeDtypeStruct((c, 1), jnp.float32),
                   jax.ShapeDtypeStruct((c, 1), jnp.float32)),
        grid=grid,
        in_specs=[x_spec, ch_spec, ch_spec],
        out_specs=(ch_spec, ch_spec),
        scratch_shapes=[pltpu.VMEM((tc, tm), jnp.float32),
                        pltpu.VMEM((tc, tm), jnp.float32)],
        compiler_params=pltpu.CompilerParams(
            dimension_semantics=("parallel", "arbitrary", "arbitrary"),
            vmem_limit_bytes=vmem_limit),
    )(x3, gamma2, beta2)

    # Pass 2: normalize (fully parallel, lane-dense output blocks).
    out3 = pl.pallas_call(
        _normalize_kernel,
        out_shape=jax.ShapeDtypeStruct((n, c, hw), x3.dtype),
        grid=grid,
        in_specs=[x_spec, ch_spec, ch_spec],
        out_specs=x_spec,
        compiler_params=pltpu.CompilerParams(
            dimension_semantics=("parallel", "parallel", "parallel"),
            vmem_limit_bytes=vmem_limit),
    )(x3, scale, shift)

    return out3.reshape(n, c, h, w)


def _reference(x_nchw, gamma, beta):
    xf = x_nchw.astype(jnp.float32)
    mean = jnp.mean(xf, axis=(0, 2, 3), keepdims=True)
    var = jnp.mean((xf - mean) ** 2, axis=(0, 2, 3), keepdims=True)
    g = gamma.reshape(1, -1, 1, 1).astype(jnp.float32)
    b = beta.reshape(1, -1, 1, 1).astype(jnp.float32)
    return ((xf - mean) * lax.rsqrt(var + EPS) * g + b).astype(x_nchw.dtype)


if __name__ == "__main__":
    key = jax.random.PRNGKey(0)

    # Case 1: fused single-pass path, f32.
    N, C, H, W = 2, 4, 16, 16
    x = jax.random.normal(key, (N, C, H, W), dtype=jnp.float32) * 2.0 + 0.5
    # Deterministic parameter init per nn.BatchNorm2d.__init__:
    # weight = ones(num_features), bias = zeros(num_features).
    gamma = jnp.ones((C,), dtype=jnp.float32)
    beta = jnp.zeros((C,), dtype=jnp.float32)
    out = jax.block_until_ready(dual_batch_norm_2d(x, gamma, beta))
    ref = _reference(x, gamma, beta)
    assert out.shape == (N, C, H, W) and out.dtype == x.dtype
    assert jnp.allclose(out, ref, atol=1e-4, rtol=1e-4)

    # Case 2: two-pass fallback path, exercised explicitly.
    N2, C2, H2, W2 = 2, 16, 8, 16
    k1, k2 = jax.random.split(key)
    x2 = jax.random.normal(k1, (N2, C2, H2, W2), dtype=jnp.float32) - 1.5
    gamma2 = jnp.ones((C2,), dtype=jnp.float32)
    beta2 = jnp.zeros((C2,), dtype=jnp.float32)
    out2 = jax.block_until_ready(
        dual_batch_norm_2d(x2, gamma2, beta2, force_two_pass=True))
    ref2 = _reference(x2, gamma2, beta2)
    assert jnp.allclose(out2, ref2, atol=1e-4, rtol=1e-4)

    # Case 3: bf16 input through the fused path (bf16 stays bf16 in HBM).
    x3 = (jax.random.normal(k2, (N2, C2, H2, W2), dtype=jnp.float32) * 3.0
          ).astype(jnp.bfloat16)
    out3 = jax.block_until_ready(dual_batch_norm_2d(x3, gamma2, beta2))
    ref3 = _reference(x3, gamma2, beta2)
    assert out3.dtype == jnp.bfloat16
    assert jnp.allclose(out3.astype(jnp.float32), ref3.astype(jnp.float32),
                        atol=3e-2, rtol=3e-2)

    print("KERNEL_OK")
</pallas_src>

<mosaic_0001>
module attributes {stable_mosaic.version = 11 : i64} {
  func.func @_fused_kernel(%arg0: i32, %arg1: memref<2x4x256xf32, #tpu.memory_space<vmem>>, %arg2: memref<4x1xf32, #tpu.memory_space<vmem>>, %arg3: memref<4x1xf32, #tpu.memory_space<vmem>>, %arg4: memref<2x4x256xf32, #tpu.memory_space<vmem>>, %arg5: memref<4x256xf32, #tpu.memory_space<vmem>>, %arg6: memref<4x256xf32, #tpu.memory_space<vmem>>) attributes {dimension_semantics = [#tpu.dimension_semantics<parallel>], iteration_bounds = array<i64: 1>, scalar_prefetch = 0 : i64, scratch_operands = 2 : i64, tpu.core_type = #tpu.core_type<tc>, window_params = [{transform_indices = @transform_0, window_bounds = array<i64: 2, 4, 256>}, {transform_indices = @transform_1, window_bounds = array<i64: 4, 1>}, {transform_indices = @transform_2, window_bounds = array<i64: 4, 1>}, {transform_indices = @transform_3, window_bounds = array<i64: 2, 4, 256>}]} {
    %cst = arith.constant 0.000000e+00 : f32
    %0 = vector.broadcast %cst : f32 to vector<4x256xf32>
    %c0 = arith.constant 0 : index
    %c0_0 = arith.constant 0 : index
    %1 = vector.load %arg5[%c0, %c0_0] : memref<4x256xf32, #tpu.memory_space<vmem>>, vector<4x256xf32>
    tpu.vector_store %arg5[%c0, %c0_0], %0 {strides = array<i32>} : memref<4x256xf32, #tpu.memory_space<vmem>>, vector<4x256xf32>,
    %c0_i32 = arith.constant 0 : i32
    %c1_i32 = arith.constant 1 : i32
    %2 = arith.muli %c0_i32, %c1_i32 : i32
    %c0_i32_1 = arith.constant 0 : i32
    %3 = arith.addi %c0_i32_1, %2 : i32
    %c0_2 = arith.constant 0 : index
    %c0_3 = arith.constant 0 : index
    %4 = vector.load %arg5[%c0_2, %c0_3] : memref<4x256xf32, #tpu.memory_space<vmem>>, vector<4x256xf32>
    %5 = arith.index_cast %3 : i32 to index
    %c0_4 = arith.constant 0 : index
    %c0_5 = arith.constant 0 : index
    %6 = vector.load %arg1[%5, %c0_4, %c0_5] : memref<2x4x256xf32, #tpu.memory_space<vmem>>, vector<1x4x256xf32>
    %7 = vector.shape_cast %6 : vector<1x4x256xf32> to vector<4x256xf32>
    %8 = arith.addf %4, %7 : vector<4x256xf32>
    %c0_6 = arith.constant 0 : index
    %c0_7 = arith.constant 0 : index
    %9 = vector.load %arg5[%c0_6, %c0_7] : memref<4x256xf32, #tpu.memory_space<vmem>>, vector<4x256xf32>
    tpu.vector_store %arg5[%c0_6, %c0_7], %8 {strides = array<i32>} : memref<4x256xf32, #tpu.memory_space<vmem>>, vector<4x256xf32>,
    %c1_i32_8 = arith.constant 1 : i32
    %c1_i32_9 = arith.constant 1 : i32
    %10 = arith.muli %c1_i32_8, %c1_i32_9 : i32
    %c0_i32_10 = arith.constant 0 : i32
    %11 = arith.addi %c0_i32_10, %10 : i32
    %c0_11 = arith.constant 0 : index
    %c0_12 = arith.constant 0 : index
    %12 = vector.load %arg5[%c0_11, %c0_12] : memref<4x256xf32, #tpu.memory_space<vmem>>, vector<4x256xf32>
    %13 = arith.index_cast %11 : i32 to index
    %c0_13 = arith.constant 0 : index
    %c0_14 = arith.constant 0 : index
    %14 = vector.load %arg1[%13, %c0_13, %c0_14] : memref<2x4x256xf32, #tpu.memory_space<vmem>>, vector<1x4x256xf32>
    %15 = vector.shape_cast %14 : vector<1x4x256xf32> to vector<4x256xf32>
    %16 = arith.addf %12, %15 : vector<4x256xf32>
    %c0_15 = arith.constant 0 : index
    %c0_16 = arith.constant 0 : index
    %17 = vector.load %arg5[%c0_15, %c0_16] : memref<4x256xf32, #tpu.memory_space<vmem>>, vector<4x256xf32>
    tpu.vector_store %arg5[%c0_15, %c0_16], %16 {strides = array<i32>} : memref<4x256xf32, #tpu.memory_space<vmem>>, vector<4x256xf32>,
    %c2_i32 = arith.constant 2 : i32
    %c0_17 = arith.constant 0 : index
    %c0_18 = arith.constant 0 : index
    %18 = vector.load %arg5[%c0_17, %c0_18] : memref<4x256xf32, #tpu.memory_space<vmem>>, vector<4x256xf32>
    %cst_19 = arith.constant dense<0.000000e+00> : vector<4xf32>
    %19 = vector.multi_reduction <add>, %18, %cst_19 [1] : vector<4x256xf32> to vector<4xf32>
    %20 = vector.shape_cast %19 : vector<4xf32> to vector<4x1xf32>
    %cst_20 = arith.constant 0.001953125 : f32
    %21 = vector.broadcast %cst_20 : f32 to vector<4x1xf32>
    %22 = arith.mulf %20, %21 : vector<4x1xf32>
    %cst_21 = arith.constant 0.000000e+00 : f32
    %23 = vector.broadcast %cst_21 : f32 to vector<4x256xf32>
    %c0_22 = arith.constant 0 : index
    %c0_23 = arith.constant 0 : index
    %24 = vector.load %arg6[%c0_22, %c0_23] : memref<4x256xf32, #tpu.memory_space<vmem>>, vector<4x256xf32>
    tpu.vector_store %arg6[%c0_22, %c0_23], %23 {strides = array<i32>} : memref<4x256xf32, #tpu.memory_space<vmem>>, vector<4x256xf32>,
    %c0_i32_24 = arith.constant 0 : i32
    %c1_i32_25 = arith.constant 1 : i32
    %25 = arith.muli %c0_i32_24, %c1_i32_25 : i32
    %c0_i32_26 = arith.constant 0 : i32
    %26 = arith.addi %c0_i32_26, %25 : i32
    %27 = arith.index_cast %26 : i32 to index
    %c0_27 = arith.constant 0 : index
    %c0_28 = arith.constant 0 : index
    %28 = vector.load %arg1[%27, %c0_27, %c0_28] : memref<2x4x256xf32, #tpu.memory_space<vmem>>, vector<1x4x256xf32>
    %29 = vector.shape_cast %28 : vector<1x4x256xf32> to vector<4x256xf32>
    %30 = vector.broadcast %22 : vector<4x1xf32> to vector<4x256xf32>
    %31 = arith.subf %29, %30 : vector<4x256xf32>
    %c0_29 = arith.constant 0 : index
    %c0_30 = arith.constant 0 : index
    %32 = vector.load %arg6[%c0_29, %c0_30] : memref<4x256xf32, #tpu.memory_space<vmem>>, vector<4x256xf32>
    %33 = arith.mulf %31, %31 : vector<4x256xf32>
    %34 = arith.addf %32, %33 : vector<4x256xf32>
    %c0_31 = arith.constant 0 : index
    %c0_32 = arith.constant 0 : index
    %35 = vector.load %arg6[%c0_31, %c0_32] : memref<4x256xf32, #tpu.memory_space<vmem>>, vector<4x256xf32>
    tpu.vector_store %arg6[%c0_31, %c0_32], %34 {strides = array<i32>} : memref<4x256xf32, #tpu.memory_space<vmem>>, vector<4x256xf32>,
    %c1_i32_33 = arith.constant 1 : i32
    %c1_i32_34 = arith.constant 1 : i32
    %36 = arith.muli %c1_i32_33, %c1_i32_34 : i32
    %c0_i32_35 = arith.constant 0 : i32
    %37 = arith.addi %c0_i32_35, %36 : i32
    %38 = arith.index_cast %37 : i32 to index
    %c0_36 = arith.constant 0 : index
    %c0_37 = arith.constant 0 : index
    %39 = vector.load %arg1[%38, %c0_36, %c0_37] : memref<2x4x256xf32, #tpu.memory_space<vmem>>, vector<1x4x256xf32>
    %40 = vector.shape_cast %39 : vector<1x4x256xf32> to vector<4x256xf32>
    %41 = vector.broadcast %22 : vector<4x1xf32> to vector<4x256xf32>
    %42 = arith.subf %40, %41 : vector<4x256xf32>
    %c0_38 = arith.constant 0 : index
    %c0_39 = arith.constant 0 : index
    %43 = vector.load %arg6[%c0_38, %c0_39] : memref<4x256xf32, #tpu.memory_space<vmem>>, vector<4x256xf32>
    %44 = arith.mulf %42, %42 : vector<4x256xf32>
    %45 = arith.addf %43, %44 : vector<4x256xf32>
    %c0_40 = arith.constant 0 : index
    %c0_41 = arith.constant 0 : index
    %46 = vector.load %arg6[%c0_40, %c0_41] : memref<4x256xf32, #tpu.memory_space<vmem>>, vector<4x256xf32>
    tpu.vector_store %arg6[%c0_40, %c0_41], %45 {strides = array<i32>} : memref<4x256xf32, #tpu.memory_space<vmem>>, vector<4x256xf32>,
    %c2_i32_42 = arith.constant 2 : i32
    %c0_43 = arith.constant 0 : index
    %c0_44 = arith.constant 0 : index
    %47 = vector.load %arg6[%c0_43, %c0_44] : memref<4x256xf32, #tpu.memory_space<vmem>>, vector<4x256xf32>
    %cst_45 = arith.constant dense<0.000000e+00> : vector<4xf32>
    %48 = vector.multi_reduction <add>, %47, %cst_45 [1] : vector<4x256xf32> to vector<4xf32>
    %49 = vector.shape_cast %48 : vector<4xf32> to vector<4x1xf32>
    %cst_46 = arith.constant 0.001953125 : f32
    %50 = vector.broadcast %cst_46 : f32 to vector<4x1xf32>
    %51 = arith.mulf %49, %50 : vector<4x1xf32>
    %c0_47 = arith.constant 0 : index
    %c0_48 = arith.constant 0 : index
    %52 = vector.load %arg2[%c0_47, %c0_48] : memref<4x1xf32, #tpu.memory_space<vmem>>, vector<4x1xf32>
    %cst_49 = arith.constant 9.99999974E-6 : f32
    %53 = vector.broadcast %cst_49 : f32 to vector<4x1xf32>
    %54 = arith.addf %51, %53 : vector<4x1xf32>
    %55 = math.rsqrt %54 : vector<4x1xf32>
    %56 = arith.mulf %52, %55 : vector<4x1xf32>
    %c0_50 = arith.constant 0 : index
    %c0_51 = arith.constant 0 : index
    %57 = vector.load %arg3[%c0_50, %c0_51] : memref<4x1xf32, #tpu.memory_space<vmem>>, vector<4x1xf32>
    %58 = arith.mulf %22, %56 : vector<4x1xf32>
    %59 = arith.subf %57, %58 : vector<4x1xf32>
    %c0_i32_52 = arith.constant 0 : i32
    %c1_i32_53 = arith.constant 1 : i32
    %60 = arith.muli %c0_i32_52, %c1_i32_53 : i32
    %c0_i32_54 = arith.constant 0 : i32
    %61 = arith.addi %c0_i32_54, %60 : i32
    %62 = arith.index_cast %61 : i32 to index
    %c0_55 = arith.constant 0 : index
    %c0_56 = arith.constant 0 : index
    %63 = vector.load %arg1[%62, %c0_55, %c0_56] : memref<2x4x256xf32, #tpu.memory_space<vmem>>, vector<1x4x256xf32>
    %64 = vector.shape_cast %63 : vector<1x4x256xf32> to vector<4x256xf32>
    %65 = vector.broadcast %56 : vector<4x1xf32> to vector<4x256xf32>
    %66 = arith.mulf %64, %65 : vector<4x256xf32>
    %67 = vector.broadcast %59 : vector<4x1xf32> to vector<4x256xf32>
    %68 = arith.addf %66, %67 : vector<4x256xf32>
    %69 = arith.index_cast %61 : i32 to index
    %c0_57 = arith.constant 0 : index
    %c0_58 = arith.constant 0 : index
    %70 = vector.load %arg4[%69, %c0_57, %c0_58] : memref<2x4x256xf32, #tpu.memory_space<vmem>>, vector<1x4x256xf32>
    %71 = vector.shape_cast %70 : vector<1x4x256xf32> to vector<4x256xf32>
    %72 = vector.shape_cast %68 : vector<4x256xf32> to vector<1x4x256xf32>
    tpu.vector_store %arg4[%69, %c0_57, %c0_58], %72 {strides = array<i32>} : memref<2x4x256xf32, #tpu.memory_space<vmem>>, vector<1x4x256xf32>,
    %c1_i32_59 = arith.constant 1 : i32
    %c1_i32_60 = arith.constant 1 : i32
    %73 = arith.muli %c1_i32_59, %c1_i32_60 : i32
    %c0_i32_61 = arith.constant 0 : i32
    %74 = arith.addi %c0_i32_61, %73 : i32
    %75 = arith.index_cast %74 : i32 to index
    %c0_62 = arith.constant 0 : index
    %c0_63 = arith.constant 0 : index
    %76 = vector.load %arg1[%75, %c0_62, %c0_63] : memref<2x4x256xf32, #tpu.memory_space<vmem>>, vector<1x4x256xf32>
    %77 = vector.shape_cast %76 : vector<1x4x256xf32> to vector<4x256xf32>
    %78 = vector.broadcast %56 : vector<4x1xf32> to vector<4x256xf32>
    %79 = arith.mulf %77, %78 : vector<4x256xf32>
    %80 = vector.broadcast %59 : vector<4x1xf32> to vector<4x256xf32>
    %81 = arith.addf %79, %80 : vector<4x256xf32>
    %82 = arith.index_cast %74 : i32 to index
    %c0_64 = arith.constant 0 : index
    %c0_65 = arith.constant 0 : index
    %83 = vector.load %arg4[%82, %c0_64, %c0_65] : memref<2x4x256xf32, #tpu.memory_space<vmem>>, vector<1x4x256xf32>
    %84 = vector.shape_cast %83 : vector<1x4x256xf32> to vector<4x256xf32>
    %85 = vector.shape_cast %81 : vector<4x256xf32> to vector<1x4x256xf32>
    tpu.vector_store %arg4[%82, %c0_64, %c0_65], %85 {strides = array<i32>} : memref<2x4x256xf32, #tpu.memory_space<vmem>>, vector<1x4x256xf32>,
    %c2_i32_66 = arith.constant 2 : i32
    return
  }
  func.func @transform_0(%arg0: i32) -> (i32, i32, i32) {
    %c0_i32 = arith.constant 0 : i32
    %c0_i32_0 = arith.constant 0 : i32
    %c0_i32_1 = arith.constant 0 : i32
    return %c0_i32, %arg0, %c0_i32_0 : i32, i32, i32
  }
  func.func @transform_1(%arg0: i32) -> (i32, i32) {
    %c0_i32 = arith.constant 0 : i32
    %c0_i32_0 = arith.constant 0 : i32
    return %arg0, %c0_i32 : i32, i32
  }
  func.func @transform_2(%arg0: i32) -> (i32, i32) {
    %c0_i32 = arith.constant 0 : i32
    %c0_i32_0 = arith.constant 0 : i32
    return %arg0, %c0_i32 : i32, i32
  }
  func.func @transform_3(%arg0: i32) -> (i32, i32, i32) {
    %c0_i32 = arith.constant 0 : i32
    %c0_i32_0 = arith.constant 0 : i32
    %c0_i32_1 = arith.constant 0 : i32
    return %c0_i32, %arg0, %c0_i32_0 : i32, i32, i32
  }
}

</mosaic_0001>

<bundles_post_ra>
// kernel: tpu_custom_call.1
= control target key start
LH: loop header
LB: loop body
LE: loop exit
PB: predicated region body
PF: predicated region fallthrough
CT: control target
= control target key end

     0   :  { %8 = vsyncpa [#allocation5], 0  ;;  %s263_s0 = inlined_call_operand.hbm [shape: f32[2,4,256], index: 0, kind: input, shape index: {}]   ;;  %s264_s1 = inlined_call_operand.vmem [shape: f32[4,1], index: 1, kind: input, shape index: {}]   ;;  %s265_s2 = inlined_call_operand.vmem [shape: f32[4,1], index: 2, kind: input, shape index: {}]   ;;  %s266_s3 = inlined_call_operand.hbm [shape: f32[2,4,256], index: 3, kind: output, shape index: {}]  }
   0x1   :  { %9 = vsyncpa [#allocation6], 0  ;;  %s197_s12 = smov [#allocation4]   ;;  %s149_s16 = scalar_lea.hbm %s263_s0, 256 }
   0x2   :  { %s15_s13 = sshll.u32 %s197_s12, 4  ;;  %p150_p0 = scmp.ne.s32.totalorder %s263_s0, %s149_s16  ;;  %s16_s13 = int_to_ptr.vmem [resolvable:$true] %s15_s13 }
   0x3   :  { %p153_p1 = scmp.lt.u32.totalorder %s149_s16, %s263_s0 }
   0x5   :  { %p155_p2 = pnand %p153_p1, %p150_p0 }
   0x7   :  { %158 = shalt.err (!%p155_p2)
}
   0x8   :  { %s159_s21 = scalar_lea.vmem %s16_s13, 256  ;;  %p164_p4 = scmp.lt.s32.totalorder %s16_s13, %s16_s13 }
   0x9   :  { %p160_p3 = scmp.ne.s32.totalorder %s16_s13, %s159_s21  ;;  %p165_p5 = scmp.lt.s32.totalorder %s159_s21, %s159_s21 }
   0xb   :  { %p166_p6 = por %p165_p5, %p164_p4 }
   0xd   :  { %p167_p7 = pnand %p166_p6, %p160_p3 }
   0xf   :  { %170 = shalt.err (!%p167_p7)
}
  0x10   :  { %s198_s22 = smov 128   ;;  %s199_s23 = smov 8  }
  0x11   :  { %21 = dma.hbm_to_vmem [thread:$0]  %s263_s0, 256, %s16_s13, [#allocation5], %s198_s22, %s198_s22, %s199_s23  }
  0x12   :  { %193 = dma.done.wait [#allocation5], 256  }
  0x13   :  { %194 = vsyncadd [#allocation5], 4294967040  ;;  %v31_v0 = vld [vmem:[#allocation4] sm:$0xff]  ;;  %v36_v1 = vld [vmem:[#allocation4 + $0x8] sm:$0xff]  ;;  %vm43_vm0 = vcmask 1043456   ;;  %v56_v9 = vlaneseq  ;;  %v201_v25 = vmov 0  }
  0x14   :  { %v37_v2 = vadd.f32 %v36_v1, %v31_v0  ;;  %v200_v7 = vmov 839922192   ;;  %145 = vset.pattern.permute.xlu1 %v201_v25  ;;  %146 = vset.pattern.permute.xlu0 %v201_v25  ;;  %v82_v29 = vld [vmem:[%s264_s1] sm:$0xf]  ;;  %s202_s29 = smov [#allocation7]  }
  0x15   :  { %v54_v8 = vunpack.c.l.s4 %v200_v7  ;;  %v57_v11 = vshrl.u32 %v56_v9, 7  ;;  %v86_v32 = vld [vmem:[%s265_s2] sm:$0xf]  ;;  %s127_s30 = sshll.u32 %s202_s29, 4  ;;  %s128_s30 = int_to_ptr.vmem [resolvable:$true] %s127_s30 }
  0x16   :  { %v41_v3 = vcombine.high %v37_v2, %v37_v2  ;;  %v44_v4 = vsel %vm43_vm0, %v37_v2, 0.0  ;;  %s171_s1 = scalar_lea.vmem %s128_s30, 256  ;;  %p176_p9 = scmp.lt.s32.totalorder %s128_s30, %s128_s30 }
  0x17   :  { %v55_v10 = vunpack.c.0.s8 %v54_v8  ;;  %p172_p8 = scmp.ne.s32.totalorder %s128_s30, %s171_s1  ;;  %p177_p10 = scmp.lt.s32.totalorder %s171_s1, %s171_s1 }
  0x18   :  { %v45_v5 = vsel %vm43_vm0, %v41_v3, 0.0 }
  0x19   :  { %v46_v6 = vadd.f32 %v45_v5, %v44_v4  ;;  %v58_v12 = vsub.s32 %v55_v10, %v57_v11  ;;  %p178_p11 = por %p177_p10, %p176_p9 }
  0x1b   :  { %47 = vadd.xlane.f32.xlu0 %v46_v6  ;;  %p179_p12 = pnand %p178_p11, %p172_p8 }
  0xa8   :  { %v48_v13 = vpop.xlane.xlu0 %47 }
  0xa9   :  { %v49_v14 = vmul.f32 0.001953125, %v48_v13 }
  0xab   :  { %v59_v15 = vrot.slane %v49_v14, %v58_v12 }
  0xad   :  { %v61_v16 = vsub.f32 %v31_v0, %v59_v15  ;;  %v67_v17 = vsub.f32 %v36_v1, %v59_v15 }
  0xaf   :  { %v63_v18 = vmul.f32 %v61_v16, %v61_v16  ;;  %v69_v19 = vmul.f32 %v67_v17, %v67_v17 }
  0xb1   :  { %v70_v20 = vadd.f32 %v69_v19, %v63_v18 }
  0xb3   :  { %v74_v21 = vcombine.high %v70_v20, %v70_v20  ;;  %v76_v22 = vsel %vm43_vm0, %v70_v20, 0.0 }
  0xb5   :  { %v77_v23 = vsel %vm43_vm0, %v74_v21, 0.0 }
  0xb6   :  { %v78_v24 = vadd.f32 %v77_v23, %v76_v22 }
  0xb8   :  { %79 = vadd.xlane.f32.xlu0 %v78_v24 }
 0x145   :  { %v80_v26 = vpop.xlane.xlu0 %79 }
 0x146   :  { %v81_v27 = vmul.f32 0.001953125, %v80_v26 }
 0x148   :  { %v83_v28 = vadd.f32 1e-05, %v81_v27 }
 0x14a   :  { %147 = vrsqrt.f32 %v83_v28 }
 0x154   :  { %v148_v30 = vpop.eup %147 }
 0x155   :  { %v85_v31 = vmul.f32 %v148_v30, %v82_v29 }
 0x157   :  { %92 = vperm.xlu1 %145, %v85_v31   ;;  %v87_v33 = vmul.f32 %v85_v31, %v49_v14 }
 0x159   :  { %v88_v34 = vsub.f32 %v86_v32, %v87_v33 }
 0x15b   :  { %105 = vperm.xlu1 %145, %v88_v34  }
 0x1d6   :  { %v93_v35 = vpop.permute.xlu1 %92 }
 0x1d7   :  { %v100_v36 = vrot.slane %v93_v35, %v58_v12 }
 0x1d9   :  { %v102_v38 = vmul.f32 %v100_v36, %v31_v0  ;;  %v118_v39 = vmul.f32 %v100_v36, %v36_v1 }
 0x1da   :  { %v106_v37 = vpop.permute.xlu1 %105 }
 0x1db   :  { %v113_v40 = vrot.slane %v106_v37, %v58_v12 }
 0x1dd   :  { %v115_v41 = vadd.f32 %v113_v40, %v102_v38  ;;  %v119_v42 = vadd.f32 %v118_v39, %v113_v40 }
 0x1df   :  { %116 = vst [vmem:[#allocation7] sm:$0xff] %v115_v41  ;;  %121 = vst [vmem:[#allocation7 + $0x8] sm:$0xff] %v119_v42 }
 0x1e0   :  { %182 = shalt.err (!%p179_p12)
}
 0x1e1   :  { %s183_s5 = scalar_lea.hbm %s266_s3, 256 }
 0x1e2   :  { %p184_p13 = scmp.ne.s32.totalorder %s266_s3, %s183_s5  ;;  %p187_p0 = scmp.lt.u32.totalorder %s183_s5, %s266_s3 }
 0x1e4   :  { %p189_p1 = pnand %p187_p0, %p184_p13 }
 0x1e6   :  { %192 = shalt.err (!%p189_p1)
}
 0x1e7   :  { %133 = dma.vmem_to_hbm [thread:$0]  %s128_s30, 256, %s266_s3, [#allocation6], %s198_s22, %s198_s22, %s199_s23  }
 0x1e8   :  { %195 = dma.done.wait [#allocation6], 256  }
 0x1e9   :  { %196 = vsyncadd [#allocation6], 4294967040 }
 0x1ea   :  { %137 = vsyncpa [#allocation5], 1 }
 0x1eb   :  { %138 = vsyncpa [#allocation6], 1 }

</bundles_post_ra>
